<compile_context>
chip_gen: v6e
topology: v6e:2x2x1
jax: 0.10.0
libtpu: 0.0.40
codegen_flags: <defaults>
</compile_context>

<pallas_src>
import functools

import jax
import jax.numpy as jnp
from jax import lax
from jax.experimental import pallas as pl
from jax.experimental.pallas import tpu as pltpu


def _i32(v):
    """Python int -> int32 constant with uint32 wraparound semantics."""
    v &= 0xFFFFFFFF
    if v >= (1 << 31):
        v -= 1 << 32
    return jnp.int32(v)


def _dropout_sampled_kernel(seed_ref, x_ref, o_ref, *,
                            emb_choice, threshold_signed, scale,
                            apply_dropout):
    tm, d_in = x_ref.shape
    d_out = o_ref.shape[-1]

    x = x_ref[...]

    if apply_dropout:
        # Global element index for this tile (unique across the whole grid) ->
        # independent dropout mask per tile, deterministic given `seed`.
        row0 = pl.program_id(0) * tm                       # int32 scalar
        r = lax.broadcasted_iota(jnp.int32, (tm, d_in), 0) + row0
        c = lax.broadcasted_iota(jnp.int32, (tm, d_in), 1)
        ctr = r * d_in + c                                 # wraps mod 2^32, fine

        seed_s = seed_ref[0]                               # int32 scalar (SMEM)
        h = ctr * _i32(0x9E3779B1) + seed_s * _i32(0x85EBCA77)
        # lowbias32-style integer mix (pure VPU ops; logical shifts).
        h = h ^ lax.shift_right_logical(h, 16)
        h = h * _i32(0x7FEB352D)
        h = h ^ lax.shift_right_logical(h, 15)
        h = h * _i32(0x846CA68B)
        h = h ^ lax.shift_right_logical(h, 16)

        # h is uniform over [-2^31, 2^31); keep with probability (1 - p).
        keep = h >= jnp.int32(threshold_signed)
        x = jnp.where(keep, x * jnp.asarray(scale, x.dtype), jnp.zeros_like(x))

    if emb_choice < d_in:
        # Only the (single) boundary lane group needs a column mask.
        col = lax.broadcasted_iota(jnp.int32, (tm, d_in), 1)
        x = jnp.where(col < emb_choice, x, jnp.zeros_like(x))

    if d_in == d_out:
        o_ref[...] = x.astype(o_ref.dtype)
    else:
        # Kept region: dense store.  Padded tail: pure zero store (no HBM read).
        o_ref[:, :d_in] = x.astype(o_ref.dtype)
        o_ref[:, d_in:] = jnp.zeros((tm, d_out - d_in), dtype=o_ref.dtype)


def dropout_sampled(x, emb_choice, super_emb, super_dropout, *,
                    training=True, seed=0, block_rows=1024):
    """Pallas implementation of DropoutSampled.forward.

    x: [B, N, super_emb].  Returns [B, N, super_emb] with dropout applied to
    the first `emb_choice` channels (training only) and the rest zero-padded.
    """
    B, N, D = x.shape
    assert D == super_emb, "last dim of x must equal super_emb"
    emb_choice = int(emb_choice)
    assert 0 <= emb_choice <= super_emb

    p = float(super_dropout) * emb_choice / float(super_emb)

    # Degenerate cases: nothing kept, or everything dropped.
    if emb_choice == 0 or (training and p >= 1.0):
        return jnp.zeros_like(x)

    rows = B * N
    x2 = x.reshape(rows, D)
    itemsize = jnp.dtype(x.dtype).itemsize

    # Columns actually DMA'd in: smallest lane-aligned (128) cover of the kept
    # slice, falling back to the full last dim when it can't be lane-aligned.
    d_up = -(-emb_choice // 128) * 128
    d_in = d_up if d_up < D else D

    # Row tile: large enough to stream near the HBM roofline, capped so that
    # double-buffered input+output tiles stay well under v7x's 64 MiB VMEM.
    max_tile_bytes = 8 * 1024 * 1024
    cap = max(32, ((max_tile_bytes // max(1, D * itemsize)) // 32) * 32)
    block_rows = min(int(block_rows), cap)
    if rows <= block_rows:
        tm = rows
    else:
        tm = max(32, (block_rows // 32) * 32)
    grid = (pl.cdiv(rows, tm),)

    apply_dropout = bool(training) and p > 0.0
    if apply_dropout:
        thr = int(round(p * (2 ** 32))) - (1 << 31)        # signed threshold
        thr = max(-(1 << 31), min((1 << 31) - 1, thr))
        scale = 1.0 / (1.0 - p)
    else:
        thr = -(1 << 31)
        scale = 1.0

    kernel = functools.partial(
        _dropout_sampled_kernel,
        emb_choice=emb_choice,
        threshold_signed=thr,
        scale=scale,
        apply_dropout=apply_dropout,
    )

    seed_arr = jnp.asarray([seed], dtype=jnp.int32)

    out = pl.pallas_call(
        kernel,
        out_shape=jax.ShapeDtypeStruct((rows, D), x.dtype),
        grid=grid,
        in_specs=[
            pl.BlockSpec(memory_space=pltpu.MemorySpace.SMEM),   # seed scalar
            pl.BlockSpec((tm, d_in), lambda i: (i, 0)),          # kept cols only
        ],
        out_specs=pl.BlockSpec((tm, D), lambda i: (i, 0)),
        compiler_params=pltpu.CompilerParams(
            dimension_semantics=("parallel",)),
        cost_estimate=pl.CostEstimate(
            flops=3 * rows * d_in,
            transcendentals=0,
            bytes_accessed=(rows * d_in + rows * D) * itemsize),
    )(seed_arr, x2)

    return out.reshape(B, N, D)


if __name__ == "__main__":
    key = jax.random.PRNGKey(0)

    B, N = 2, 8
    super_emb = 32
    emb_choice = 24
    super_dropout = 0.1

    x = jax.random.normal(key, (B, N, super_emb), dtype=jnp.float32)

    # --- eval mode: exact reference check (deterministic path) ---
    y_eval = dropout_sampled(x, emb_choice, super_emb, super_dropout,
                             training=False)
    y_eval = jax.block_until_ready(y_eval)
    ref_eval = jnp.pad(x[:, :, :emb_choice],
                       ((0, 0), (0, 0), (0, super_emb - emb_choice)))
    assert y_eval.shape == (B, N, super_emb)
    assert jnp.allclose(y_eval, ref_eval), "eval-mode mismatch"

    # --- training mode: dropout on the first emb_choice channels, zero pad ---
    y_tr = dropout_sampled(x, emb_choice, super_emb, super_dropout,
                           training=True, seed=42)
    y_tr = jax.block_until_ready(y_tr)
    assert y_tr.shape == (B, N, super_emb)
    # padded tail must be exactly zero
    assert jnp.all(y_tr[:, :, emb_choice:] == 0.0), "padding not zero"

    p = super_dropout * emb_choice / super_emb
    scale = 1.0 / (1.0 - p)
    body = y_tr[:, :, :emb_choice]
    kept = body != 0.0
    # surviving (non-dropped) elements are scaled by 1/(1-p)
    assert jnp.allclose(
        jnp.where(kept, body, 0.0),
        jnp.where(kept, x[:, :, :emb_choice] * scale, 0.0),
        rtol=1e-5, atol=1e-5,
    ), "training-mode scaling mismatch"

    # some elements dropped, some kept (p = 0.075 over 384 elements)
    n_tot = B * N * emb_choice
    n_drop = int(jnp.sum(~kept))
    assert 0 < n_drop < n_tot, "dropout mask looks degenerate"

    print("KERNEL_OK")
</pallas_src>

<mosaic_0001>
module attributes {stable_mosaic.version = 11 : i64} {
  func.func @_dropout_sampled_kernel(%arg0: i32, %arg1: memref<1xi32, #tpu.memory_space<smem>>, %arg2: memref<16x32xf32, #tpu.memory_space<vmem>>, %arg3: memref<16x32xf32, #tpu.memory_space<vmem>>) attributes {dimension_semantics = [#tpu.dimension_semantics<parallel>], iteration_bounds = array<i64: 1>, scalar_prefetch = 0 : i64, scratch_operands = 0 : i64, tpu.core_type = #tpu.core_type<tc>, window_params = [{transform_indices = @transform_0, window_bounds = array<i64: 1>}, {transform_indices = @transform_1, window_bounds = array<i64: 16, 32>}, {transform_indices = @transform_2, window_bounds = array<i64: 16, 32>}]} {
    %c0 = arith.constant 0 : index
    %c0_0 = arith.constant 0 : index
    %0 = vector.load %arg2[%c0, %c0_0] : memref<16x32xf32, #tpu.memory_space<vmem>>, vector<16x32xf32>
    %1 = tpu.iota {dimensions = array<i32: 1>} : vector<16x32xi32>
    %c24_i32 = arith.constant 24 : i32
    %2 = vector.broadcast %c24_i32 : i32 to vector<16x32xi32>
    %3 = arith.cmpi slt, %1, %2 : vector<16x32xi32>
    %cst = arith.constant 0.000000e+00 : f32
    %4 = vector.broadcast %cst : f32 to vector<16x32xf32>
    %5 = arith.select %3, %0, %4 : vector<16x32xi1>, vector<16x32xf32>
    %c0_1 = arith.constant 0 : index
    %c0_2 = arith.constant 0 : index
    %6 = vector.load %arg3[%c0_1, %c0_2] : memref<16x32xf32, #tpu.memory_space<vmem>>, vector<16x32xf32>
    tpu.vector_store %arg3[%c0_1, %c0_2], %5 {strides = array<i32>} : memref<16x32xf32, #tpu.memory_space<vmem>>, vector<16x32xf32>,
    return
  }
  func.func @transform_0(%arg0: i32) -> i32 {
    %c0_i32 = arith.constant 0 : i32
    %c0_i32_0 = arith.constant 0 : i32
    return %c0_i32 : i32
  }
  func.func @transform_1(%arg0: i32) -> (i32, i32) {
    %c0_i32 = arith.constant 0 : i32
    %c0_i32_0 = arith.constant 0 : i32
    return %arg0, %c0_i32 : i32, i32
  }
  func.func @transform_2(%arg0: i32) -> (i32, i32) {
    %c0_i32 = arith.constant 0 : i32
    %c0_i32_0 = arith.constant 0 : i32
    return %arg0, %c0_i32 : i32, i32
  }
}

</mosaic_0001>

<bundles_post_ra>
// kernel: tpu_custom_call.1
= control target key start
LH: loop header
LB: loop body
LE: loop exit
PB: predicated region body
PF: predicated region fallthrough
CT: control target
= control target key end

     0   :  { %8 = vsyncpa [#allocation4], 0  ;;  %s127_s0 = inlined_call_operand.<no memory space> [shape: s32[1], index: 0, kind: input, shape index: {}]   ;;  %s128_s1 = inlined_call_operand.hbm [shape: f32[16,32], index: 1, kind: input, shape index: {}]   ;;  %s129_s2 = inlined_call_operand.hbm [shape: f32[16,32], index: 2, kind: output, shape index: {}]  }
   0x1   :  { %9 = vsyncpa [#allocation5], 0  ;;  %s102_s9 = smov [#allocation3]  }
   0x2   :  { %s17_s10 = sshll.u32 %s102_s9, 4  ;;  %s18_s10 = int_to_ptr.vmem [resolvable:$true] %s17_s10 }
   0x3   :  { %s66_s11 = scalar_lea.vmem %s18_s10, 256  ;;  %p71_p1 = scmp.lt.s32.totalorder %s18_s10, %s18_s10 }
   0x4   :  { %p67_p0 = scmp.ne.s32.totalorder %s18_s10, %s66_s11  ;;  %p72_p2 = scmp.lt.s32.totalorder %s66_s11, %s66_s11 }
   0x6   :  { %p73_p3 = por %p72_p2, %p71_p1 }
   0x8   :  { %p74_p4 = pnand %p73_p3, %p67_p0 }
   0xa   :  { %77 = shalt.err (!%p74_p4)
}
   0xb   :  { %s103_s12 = smov 128   ;;  %s104_s0 = smov 8  }
   0xc   :  { %23 = dma.hbm_to_vmem [thread:$0]  %s128_s1, 256, %s18_s10, [#allocation4], %s103_s12, %s103_s12, %s104_s0  }
   0xd   :  { %98 = dma.done.wait [#allocation4], 256  }
   0xe   :  { %99 = vsyncadd [#allocation4], 4294967040  ;;  %v29_v0 = vlaneseq  ;;  %s105_s15 = smov [#allocation6]   ;;  %vm34_vm1 = vcmask 261120   ;;  %v27_v2 = vld [vmem:[#allocation3] sm:$0xff]  ;;  %v28_v3 = vld [vmem:[#allocation3 + $0x8] sm:$0xff] }
   0xf   :  { %s42_s16 = sshll.u32 %s105_s15, 4  ;;  %s43_s16 = int_to_ptr.vmem [resolvable:$true] %s42_s16 }
  0x10   :  { %v30_v1 = vand.u32 127, %v29_v0  ;;  %s78_s17 = scalar_lea.vmem %s43_s16, 256  ;;  %p83_p6 = scmp.lt.s32.totalorder %s43_s16, %s43_s16 }
  0x11   :  { %p79_p5 = scmp.ne.s32.totalorder %s43_s16, %s78_s17  ;;  %p84_p7 = scmp.lt.s32.totalorder %s78_s17, %s78_s17 }
  0x12   :  { %vm31_vm0 = vcmp.lt.s32.totalorder %v30_v1, 24 }
  0x13   :  { %v32_v4 = vsel %vm31_vm0, %v27_v2, 0.0  ;;  %v33_v5 = vsel %vm31_vm0, %v28_v3, 0.0  ;;  %p85_p8 = por %p84_p7, %p83_p6 }
  0x14   :  { %35 = vst.msk [vmem:[#allocation6] sm:$0xff] %vm34_vm1, %v32_v4  ;;  %36 = vst.msk [vmem:[#allocation6 + $0x8] sm:$0xff] %vm34_vm1, %v33_v5 }
  0x15   :  { %p86_p9 = pnand %p85_p8, %p79_p5 }
  0x17   :  { %89 = shalt.err (!%p86_p9)
}
  0x18   :  { %48 = dma.vmem_to_hbm [thread:$0]  %s43_s16, 256, %s129_s2, [#allocation5], %s103_s12, %s103_s12, %s104_s0  }
  0x19   :  { %100 = dma.done.wait [#allocation5], 256  }
  0x1a   :  { %101 = vsyncadd [#allocation5], 4294967040 }
  0x1b   :  { %52 = vsyncpa [#allocation4], 1 }
  0x1c   :  { %53 = vsyncpa [#allocation5], 1 }

</bundles_post_ra>
